<compile_context>
chip_gen: v7x
topology: tpu7x:2x2x1
jax: 0.10.0
libtpu: 0.0.40
codegen_flags: <defaults>
</compile_context>

<pallas_src>
import functools

import jax
import jax.numpy as jnp
from jax.experimental import pallas as pl
from jax.experimental.pallas import tpu as pltpu


def _round_up(x, m):
    return ((x + m - 1) // m) * m


def _dqn_kernel(x_ref, w1_ref, b1_ref, w2_ref, b2_ref, w3_ref, b3_ref,
                out_ref, *, n_actions):
    """fc1 -> ReLU -> fc2 -> ReLU -> fc3 plus fused greedy argmax.

    Single lane-dense output tile:
      lanes [0, n_actions) : Q values (f32)
      lane  n_actions      : greedy action index, stored as an f32 value
      lanes > n_actions    : zero padding
    """
    compute_dtype = w1_ref.dtype

    x = x_ref[...].astype(compute_dtype)
    h1 = jnp.dot(x, w1_ref[...], preferred_element_type=jnp.float32) + b1_ref[...]
    h1 = jnp.maximum(h1, 0.0)                                   # ReLU (f32, VPU)

    h2 = jnp.dot(h1.astype(compute_dtype), w2_ref[...],
                 preferred_element_type=jnp.float32) + b2_ref[...]
    h2 = jnp.maximum(h2, 0.0)                                   # ReLU (f32, VPU)

    q = jnp.dot(h2.astype(compute_dtype), w3_ref[...],
                preferred_element_type=jnp.float32) + b3_ref[...]

    # Fused greedy action: argmax over the real (unpadded) action lanes,
    # min-index tie-break (matches jnp/torch argmax).
    lane = jax.lax.broadcasted_iota(jnp.int32, q.shape, dimension=1)
    valid = lane < n_actions
    q_masked = jnp.where(valid, q, -jnp.inf)
    q_max = jnp.max(q_masked, axis=-1, keepdims=True)
    big = jnp.int32(jnp.iinfo(jnp.int32).max)
    idx = jnp.min(jnp.where((q_masked == q_max) & valid, lane, big),
                  axis=-1, keepdims=True)                       # (tb, 1) int32

    # Pack the action into padding lane `n_actions` of the Q tile: one
    # lane-dense store, no second (tb, 1) lane-sparse output DMA.
    out = jnp.where(lane == n_actions, idx.astype(jnp.float32), q)
    out_ref[...] = out.astype(out_ref.dtype)                    # unmasked vst


def prepare_params(params, compute_dtype=jnp.bfloat16):
    """One-time prep:
      * transpose PyTorch-convention [out, in] weights to [in, out]
      * zero-pad hidden dims to multiples of 128 lanes; the input dim only to
        a multiple of 8 sublanes (keeps state/w1 DMA small)
      * reserve one extra output lane (n_actions + 1 before 128-rounding) for
        the fused greedy-action index
      * cast weights to bf16 by default (MXU-native with f32 accumulation on
        v5e/v6e/v7x; halves weight DMA). Biases stay f32.
    Padded weight columns / bias entries are zero, so padding never leaks
    through ReLU or into the masked argmax."""
    def pad_w(w_t, rows, cols):
        out = jnp.zeros((rows, cols), jnp.float32)
        out = out.at[: w_t.shape[0], : w_t.shape[1]].set(w_t.astype(jnp.float32))
        return out.astype(compute_dtype)

    def pad_b(b, cols):
        out = jnp.zeros((1, cols), jnp.float32)
        return out.at[0, : b.shape[0]].set(b.astype(jnp.float32))

    d_in, fc1 = params["w1"].shape[1], params["w1"].shape[0]
    fc2, n_act = params["w2"].shape[0], params["w3"].shape[0]
    d_in_p = _round_up(d_in, 8)                  # sublane padding only
    fc1_p, fc2_p = _round_up(fc1, 128), _round_up(fc2, 128)
    n_out_p = _round_up(n_act + 1, 128)          # +1 lane for fused argmax

    return {
        "w1": pad_w(params["w1"].T, d_in_p, fc1_p), "b1": pad_b(params["b1"], fc1_p),
        "w2": pad_w(params["w2"].T, fc1_p, fc2_p),  "b2": pad_b(params["b2"], fc2_p),
        "w3": pad_w(params["w3"].T, fc2_p, n_out_p), "b3": pad_b(params["b3"], n_out_p),
    }


def _choose_batch_tile(B):
    """>=8 sublanes; for B > 8 force >=2 grid steps so the 'parallel' axis
    shards across v7x's two TensorCores; cap at 512 rows so replay batches
    (512-4096) run in a handful of overhead-amortized steps."""
    if B <= 8:
        return 8
    return min(512, _round_up((B + 1) // 2, 8))


@functools.partial(jax.jit, static_argnames=("n_actions",))
def dqn_forward(state, prepared, *, n_actions):
    """state: [B, D_in] f32. prepared: output of prepare_params().
    Returns (q_values [B, n_actions] f32, greedy_action [B] int32)."""
    B, d_in = state.shape
    d_in_p, fc1_p = prepared["w1"].shape
    _, fc2_p = prepared["w2"].shape
    _, n_out_p = prepared["w3"].shape

    tb = _choose_batch_tile(B)
    b_pad = _round_up(B, tb)

    x = state.astype(jnp.float32)
    if b_pad != B or d_in_p != d_in:
        # Only batch rows (and, if D_in % 8 != 0, a few feature columns) get
        # padded; no 128-lane feature padding of the state any more.
        x = jnp.pad(x, ((0, b_pad - B), (0, d_in_p - d_in)))

    grid_spec = pltpu.PrefetchScalarGridSpec(
        num_scalar_prefetch=0,
        grid=(b_pad // tb,),
        in_specs=[
            pl.BlockSpec((tb, d_in_p), lambda i: (i, 0)),        # state tile
            pl.BlockSpec((d_in_p, fc1_p), lambda i: (0, 0)),     # w1 (VMEM-resident)
            pl.BlockSpec((1, fc1_p), lambda i: (0, 0)),          # b1
            pl.BlockSpec((fc1_p, fc2_p), lambda i: (0, 0)),      # w2
            pl.BlockSpec((1, fc2_p), lambda i: (0, 0)),          # b2
            pl.BlockSpec((fc2_p, n_out_p), lambda i: (0, 0)),    # w3
            pl.BlockSpec((1, n_out_p), lambda i: (0, 0)),        # b3
        ],
        out_specs=pl.BlockSpec((tb, n_out_p), lambda i: (i, 0)), # Q + action
    )

    out = pl.pallas_call(
        functools.partial(_dqn_kernel, n_actions=n_actions),
        out_shape=jax.ShapeDtypeStruct((b_pad, n_out_p), jnp.float32),
        grid_spec=grid_spec,
        compiler_params=pltpu.CompilerParams(
            dimension_semantics=("parallel",)),
    )(x, prepared["w1"], prepared["b1"], prepared["w2"], prepared["b2"],
      prepared["w3"], prepared["b3"])

    q = out[:B, :n_actions]
    act = out[:B, n_actions].astype(jnp.int32)
    return q, act


def init_params(key, input_dim, fc1_dims, fc2_dims, n_actions):
    """Deterministic init mimicking nn.Linear's U(-1/sqrt(fan_in), 1/sqrt(fan_in))."""
    ks = jax.random.split(key, 6)

    def lin(kw, kb, fan_in, fan_out):
        bound = 1.0 / jnp.sqrt(jnp.float32(fan_in))
        w = jax.random.uniform(kw, (fan_out, fan_in), jnp.float32, -bound, bound)
        b = jax.random.uniform(kb, (fan_out,), jnp.float32, -bound, bound)
        return w, b

    w1, b1 = lin(ks[0], ks[1], input_dim, fc1_dims)
    w2, b2 = lin(ks[2], ks[3], fc1_dims, fc2_dims)
    w3, b3 = lin(ks[4], ks[5], fc2_dims, n_actions)
    return {"w1": w1, "b1": b1, "w2": w2, "b2": b2, "w3": w3, "b3": b3}


def reference_forward(state, p):
    h1 = jnp.maximum(state @ p["w1"].T + p["b1"], 0.0)
    h2 = jnp.maximum(h1 @ p["w2"].T + p["b2"], 0.0)
    return h2 @ p["w3"].T + p["b3"]


if __name__ == "__main__":
    # DeepQNetwork(lr=..., input_dims=(8,), fc1_dims=32, fc2_dims=32, n_actions=4)
    # TODO(synk): optimizer (Adam) / MSE loss / device placement are training
    # machinery, not part of the forward pass, and are not translated.
    B, D_IN, FC1, FC2, N_ACT = 2, 8, 32, 32, 4

    key = jax.random.PRNGKey(0)
    k_params, k_state = jax.random.split(key)
    params = init_params(k_params, D_IN, FC1, FC2, N_ACT)
    state = jax.random.normal(k_state, (B, D_IN), jnp.float32)

    ref_q = reference_forward(state, params)
    ref_act = jnp.argmax(ref_q, axis=-1)

    # f32-weight path: exactness check of the fused kernel.
    prep_f32 = prepare_params(params, compute_dtype=jnp.float32)
    q, act = dqn_forward(state, prep_f32, n_actions=N_ACT)
    q, act = jax.block_until_ready((q, act))
    assert q.shape == (B, N_ACT) and act.shape == (B,)
    assert jnp.allclose(q, ref_q, atol=1e-5, rtol=1e-5), "f32 Q mismatch"
    assert jnp.array_equal(act, ref_act), "f32 argmax mismatch"

    # Default bf16-weight path (MXU fast path + half weight DMA on all gens).
    prep_bf16 = prepare_params(params)
    q16, act16 = dqn_forward(state, prep_bf16, n_actions=N_ACT)
    q16 = jax.block_until_ready(q16)
    assert jnp.allclose(q16, ref_q, atol=5e-2, rtol=5e-2), "bf16 Q mismatch"

    # Replay-buffer-style batch: exercises the multi-step "parallel" grid
    # (2 steps here -> both v7x TensorCores busy) and the batch-pad path.
    big_state = jax.random.normal(jax.random.PRNGKey(1), (513, D_IN), jnp.float32)
    ref_qb = reference_forward(big_state, params)
    qb, actb = dqn_forward(big_state, prep_f32, n_actions=N_ACT)
    qb, actb = jax.block_until_ready((qb, actb))
    assert jnp.allclose(qb, ref_qb, atol=1e-5, rtol=1e-5), "batched Q mismatch"
    assert jnp.array_equal(actb, jnp.argmax(ref_qb, axis=-1)), "batched argmax mismatch"

    print("KERNEL_OK")
</pallas_src>

<mosaic_0001>
module attributes {stable_mosaic.version = 11 : i64} {
  func.func @_dqn_kernel(%arg0: i32, %arg1: memref<8x8xf32, #tpu.memory_space<vmem>>, %arg2: memref<8x128xf32, #tpu.memory_space<vmem>>, %arg3: memref<1x128xf32, #tpu.memory_space<vmem>>, %arg4: memref<128x128xf32, #tpu.memory_space<vmem>>, %arg5: memref<1x128xf32, #tpu.memory_space<vmem>>, %arg6: memref<128x128xf32, #tpu.memory_space<vmem>>, %arg7: memref<1x128xf32, #tpu.memory_space<vmem>>, %arg8: memref<8x128xf32, #tpu.memory_space<vmem>>) attributes {dimension_semantics = [#tpu.dimension_semantics<parallel>], iteration_bounds = array<i64: 1>, scalar_prefetch = 0 : i64, scratch_operands = 0 : i64, tpu.core_type = #tpu.core_type<tc>, window_params = [{transform_indices = @transform_0, window_bounds = array<i64: 8, 8>}, {pipeline_mode = #tpu.pipeline_mode<synchronous>, transform_indices = @transform_1, window_bounds = array<i64: 8, 128>}, {pipeline_mode = #tpu.pipeline_mode<synchronous>, transform_indices = @transform_2, window_bounds = array<i64: 1, 128>}, {pipeline_mode = #tpu.pipeline_mode<synchronous>, transform_indices = @transform_3, window_bounds = array<i64: 128, 128>}, {pipeline_mode = #tpu.pipeline_mode<synchronous>, transform_indices = @transform_4, window_bounds = array<i64: 1, 128>}, {pipeline_mode = #tpu.pipeline_mode<synchronous>, transform_indices = @transform_5, window_bounds = array<i64: 128, 128>}, {pipeline_mode = #tpu.pipeline_mode<synchronous>, transform_indices = @transform_6, window_bounds = array<i64: 1, 128>}, {transform_indices = @transform_7, window_bounds = array<i64: 8, 128>}]} {
    %c0 = arith.constant 0 : index
    %c0_0 = arith.constant 0 : index
    %0 = vector.load %arg1[%c0, %c0_0] : memref<8x8xf32, #tpu.memory_space<vmem>>, vector<8x8xf32>
    %c0_1 = arith.constant 0 : index
    %c0_2 = arith.constant 0 : index
    %1 = vector.load %arg2[%c0_1, %c0_2] : memref<8x128xf32, #tpu.memory_space<vmem>>, vector<8x128xf32>
    %cst = arith.constant dense<0.000000e+00> : vector<8x128xf32>
    %2 = tpu.matmul %0, %1, %cst {dimension_numbers = #tpu.dot_dimension_numbers<[1], [0], [0], [1], [0, 0, 1, 1], [], []>} : vector<8x8xf32>, vector<8x128xf32>, vector<8x128xf32> -> vector<8x128xf32>
    %c0_3 = arith.constant 0 : index
    %c0_4 = arith.constant 0 : index
    %3 = vector.load %arg3[%c0_3, %c0_4] : memref<1x128xf32, #tpu.memory_space<vmem>>, vector<1x128xf32>
    %4 = vector.broadcast %3 : vector<1x128xf32> to vector<8x128xf32>
    %5 = arith.addf %2, %4 : vector<8x128xf32>
    %cst_5 = arith.constant 0.000000e+00 : f32
    %6 = vector.broadcast %cst_5 : f32 to vector<8x128xf32>
    %7 = arith.maximumf %5, %6 : vector<8x128xf32>
    %c0_6 = arith.constant 0 : index
    %c0_7 = arith.constant 0 : index
    %8 = vector.load %arg4[%c0_6, %c0_7] : memref<128x128xf32, #tpu.memory_space<vmem>>, vector<128x128xf32>
    %cst_8 = arith.constant dense<0.000000e+00> : vector<8x128xf32>
    %9 = tpu.matmul %7, %8, %cst_8 {dimension_numbers = #tpu.dot_dimension_numbers<[1], [0], [0], [1], [0, 0, 1, 1], [], []>} : vector<8x128xf32>, vector<128x128xf32>, vector<8x128xf32> -> vector<8x128xf32>
    %c0_9 = arith.constant 0 : index
    %c0_10 = arith.constant 0 : index
    %10 = vector.load %arg5[%c0_9, %c0_10] : memref<1x128xf32, #tpu.memory_space<vmem>>, vector<1x128xf32>
    %11 = vector.broadcast %10 : vector<1x128xf32> to vector<8x128xf32>
    %12 = arith.addf %9, %11 : vector<8x128xf32>
    %cst_11 = arith.constant 0.000000e+00 : f32
    %13 = vector.broadcast %cst_11 : f32 to vector<8x128xf32>
    %14 = arith.maximumf %12, %13 : vector<8x128xf32>
    %c0_12 = arith.constant 0 : index
    %c0_13 = arith.constant 0 : index
    %15 = vector.load %arg6[%c0_12, %c0_13] : memref<128x128xf32, #tpu.memory_space<vmem>>, vector<128x128xf32>
    %cst_14 = arith.constant dense<0.000000e+00> : vector<8x128xf32>
    %16 = tpu.matmul %14, %15, %cst_14 {dimension_numbers = #tpu.dot_dimension_numbers<[1], [0], [0], [1], [0, 0, 1, 1], [], []>} : vector<8x128xf32>, vector<128x128xf32>, vector<8x128xf32> -> vector<8x128xf32>
    %c0_15 = arith.constant 0 : index
    %c0_16 = arith.constant 0 : index
    %17 = vector.load %arg7[%c0_15, %c0_16] : memref<1x128xf32, #tpu.memory_space<vmem>>, vector<1x128xf32>
    %18 = vector.broadcast %17 : vector<1x128xf32> to vector<8x128xf32>
    %19 = arith.addf %16, %18 : vector<8x128xf32>
    %20 = tpu.iota {dimensions = array<i32: 1>} : vector<8x128xi32>
    %c4_i32 = arith.constant 4 : i32
    %21 = vector.broadcast %c4_i32 : i32 to vector<8x128xi32>
    %22 = arith.cmpi slt, %20, %21 : vector<8x128xi32>
    %cst_17 = arith.constant 0xFF800000 : f32
    %23 = vector.broadcast %cst_17 : f32 to vector<8x128xf32>
    %24 = arith.select %22, %19, %23 : vector<8x128xi1>, vector<8x128xf32>
    %cst_18 = arith.constant dense<0xFF800000> : vector<8xf32>
    %25 = vector.multi_reduction <maximumf>, %24, %cst_18 [1] : vector<8x128xf32> to vector<8xf32>
    %26 = vector.shape_cast %25 : vector<8xf32> to vector<8x1xf32>
    %27 = vector.broadcast %26 : vector<8x1xf32> to vector<8x128xf32>
    %28 = arith.cmpf oeq, %24, %27 : vector<8x128xf32>
    %29 = arith.andi %28, %22 : vector<8x128xi1>
    %c2147483647_i32 = arith.constant 2147483647 : i32
    %30 = vector.broadcast %c2147483647_i32 : i32 to vector<8x128xi32>
    %31 = arith.select %29, %20, %30 : vector<8x128xi1>, vector<8x128xi32>
    %cst_19 = arith.constant dense<2147483647> : vector<8xi32>
    %32 = vector.multi_reduction <minsi>, %31, %cst_19 [1] : vector<8x128xi32> to vector<8xi32>
    %33 = vector.shape_cast %32 : vector<8xi32> to vector<8x1xi32>
    %c4_i32_20 = arith.constant 4 : i32
    %34 = vector.broadcast %c4_i32_20 : i32 to vector<8x128xi32>
    %35 = arith.cmpi eq, %20, %34 : vector<8x128xi32>
    %36 = arith.sitofp %33 : vector<8x1xi32> to vector<8x1xf32>
    %37 = vector.shape_cast %36 : vector<8x1xf32> to vector<8x1xf32>
    %38 = vector.broadcast %37 : vector<8x1xf32> to vector<8x128xf32>
    %39 = arith.select %35, %38, %19 : vector<8x128xi1>, vector<8x128xf32>
    %c0_21 = arith.constant 0 : index
    %c0_22 = arith.constant 0 : index
    %40 = vector.load %arg8[%c0_21, %c0_22] : memref<8x128xf32, #tpu.memory_space<vmem>>, vector<8x128xf32>
    tpu.vector_store %arg8[%c0_21, %c0_22], %39 {strides = array<i32>} : memref<8x128xf32, #tpu.memory_space<vmem>>, vector<8x128xf32>,
    return
  }
  func.func @transform_0(%arg0: i32) -> (i32, i32) {
    %c0_i32 = arith.constant 0 : i32
    %c0_i32_0 = arith.constant 0 : i32
    return %arg0, %c0_i32 : i32, i32
  }
  func.func @transform_1(%arg0: i32) -> (i32, i32) {
    %c0_i32 = arith.constant 0 : i32
    %c0_i32_0 = arith.constant 0 : i32
    %c0_i32_1 = arith.constant 0 : i32
    return %c0_i32, %c0_i32_0 : i32, i32
  }
  func.func @transform_2(%arg0: i32) -> (i32, i32) {
    %c0_i32 = arith.constant 0 : i32
    %c0_i32_0 = arith.constant 0 : i32
    %c0_i32_1 = arith.constant 0 : i32
    return %c0_i32, %c0_i32_0 : i32, i32
  }
  func.func @transform_3(%arg0: i32) -> (i32, i32) {
    %c0_i32 = arith.constant 0 : i32
    %c0_i32_0 = arith.constant 0 : i32
    %c0_i32_1 = arith.constant 0 : i32
    return %c0_i32, %c0_i32_0 : i32, i32
  }
  func.func @transform_4(%arg0: i32) -> (i32, i32) {
    %c0_i32 = arith.constant 0 : i32
    %c0_i32_0 = arith.constant 0 : i32
    %c0_i32_1 = arith.constant 0 : i32
    return %c0_i32, %c0_i32_0 : i32, i32
  }
  func.func @transform_5(%arg0: i32) -> (i32, i32) {
    %c0_i32 = arith.constant 0 : i32
    %c0_i32_0 = arith.constant 0 : i32
    %c0_i32_1 = arith.constant 0 : i32
    return %c0_i32, %c0_i32_0 : i32, i32
  }
  func.func @transform_6(%arg0: i32) -> (i32, i32) {
    %c0_i32 = arith.constant 0 : i32
    %c0_i32_0 = arith.constant 0 : i32
    %c0_i32_1 = arith.constant 0 : i32
    return %c0_i32, %c0_i32_0 : i32, i32
  }
  func.func @transform_7(%arg0: i32) -> (i32, i32) {
    %c0_i32 = arith.constant 0 : i32
    %c0_i32_0 = arith.constant 0 : i32
    return %arg0, %c0_i32 : i32, i32
  }
}

</mosaic_0001>

<bundles_post_ra>
// kernel: dqn_forward.1
= control target key start
LH: loop header
LB: loop body
LE: loop exit
PB: predicated region body
PF: predicated region fallthrough
CT: control target
= control target key end

     0   :  { %12 = vsyncpa [#allocation3], 0  ;;  %s684_s0 = inlined_call_operand.vmem [shape: f32[8,8], index: 0, kind: input, shape index: {}]   ;;  %s685_s1 = inlined_call_operand.vmem [shape: f32[8,128], index: 1, kind: input, shape index: {}]   ;;  %s686_s2 = inlined_call_operand.vmem [shape: f32[1,128], index: 2, kind: input, shape index: {}]   ;;  %s687_s3 = inlined_call_operand.hbm [shape: f32[128,128], index: 3, kind: input, shape index: {}]   ;;  %s688_s4 = inlined_call_operand.vmem [shape: f32[1,128], index: 4, kind: input, shape index: {}]   ;;  %s689_s5 = inlined_call_operand.hbm [shape: f32[128,128], index: 5, kind: input, shape index: {}]   ;;  %s690_s6 = inlined_call_operand.vmem [shape: f32[1,128], index: 6, kind: input, shape index: {}]   ;;  %s691_s7 = inlined_call_operand.vmem [shape: f32[8,128], index: 7, kind: output, shape index: {}]  }
   0x1   :  { %13 = vsyncpa [#allocation5], 0  ;;  %s576_s24 = smov [#allocation2]   ;;  %s528_s28 = scalar_lea.hbm %s687_s3, 2048 }
   0x2   :  { %s25_s25 = sshll.u32 %s576_s24, 4  ;;  %p529_p0 = scmp.ne.s32.totalorder %s687_s3, %s528_s28  ;;  %s26_s25 = int_to_ptr.vmem [resolvable:$true] %s25_s25 }
   0x3   :  { %p532_p1 = scmp.lt.u32.totalorder %s528_s28, %s687_s3 }
   0x5   :  { %p534_p2 = pnand %p532_p1, %p529_p0 }
   0x7   :  { %537 = shalt.err (!%p534_p2)
}
   0x8   :  { %s538_s10 = scalar_lea.vmem %s26_s25, 2048  ;;  %p543_p4 = scmp.lt.s32.totalorder %s26_s25, %s26_s25 }
   0x9   :  { %p539_p3 = scmp.ne.s32.totalorder %s26_s25, %s538_s10  ;;  %p544_p5 = scmp.lt.s32.totalorder %s538_s10, %s538_s10 }
   0xb   :  { %p545_p6 = por %p544_p5, %p543_p4 }
   0xd   :  { %p546_p7 = pnand %p545_p6, %p539_p3 }
   0xf   :  { %549 = shalt.err (!%p546_p7)
}
  0x10   :  { %s577_s11 = smov 128   ;;  %s578_s12 = smov 8  }
  0x11   :  { %31 = dma.hbm_to_vmem [thread:$0]  %s687_s3, 2048, %s26_s25, [#allocation3], %s577_s11, %s577_s11, %s578_s12  }
  0x12   :  { %s579_s15 = smov [#allocation4]   ;;  %s550_s19 = scalar_lea.hbm %s689_s5, 2048 }
  0x13   :  { %s39_s16 = sshll.u32 %s579_s15, 4  ;;  %p551_p8 = scmp.ne.s32.totalorder %s689_s5, %s550_s19  ;;  %s40_s16 = int_to_ptr.vmem [resolvable:$true] %s39_s16 }
  0x14   :  { %p554_p9 = scmp.lt.u32.totalorder %s550_s19, %s689_s5 }
  0x16   :  { %p556_p10 = pnand %p554_p9, %p551_p8 }
  0x18   :  { %559 = shalt.err (!%p556_p10)
}
  0x19   :  { %s560_s24 = scalar_lea.vmem %s40_s16, 2048  ;;  %p565_p12 = scmp.lt.s32.totalorder %s40_s16, %s40_s16 }
  0x1a   :  { %p561_p11 = scmp.ne.s32.totalorder %s40_s16, %s560_s24  ;;  %p566_p13 = scmp.lt.s32.totalorder %s560_s24, %s560_s24 }
  0x1c   :  { %p567_p0 = por %p566_p13, %p565_p12 }
  0x1e   :  { %p568_p1 = pnand %p567_p0, %p561_p11 }
  0x20   :  { %571 = shalt.err (!%p568_p1)
}
  0x21   :  { %45 = dma.hbm_to_vmem [thread:$0]  %s689_s5, 2048, %s40_s16, [#allocation5], %s577_s11, %s577_s11, %s578_s12  }
  0x22   :  { %572 = dma.done.wait [#allocation3], 2048  }
  0x23   :  { %573 = vsyncadd [#allocation3], 4294965248 }
  0x24   :  { %574 = dma.done.wait [#allocation5], 2048  }
  0x25   :  { %575 = vsyncadd [#allocation5], 4294965248  ;;  %v580_v0 = vmov 0.0   ;;  %vm581_vm0 = vmmov 0   ;;  %v582_v1 = vmov 0.0|0.0   ;;  %vm63_vm1 = vcmask 64512  }
  0x26   :  { %398 = vmatprep.subr.mxu0 %v580_v0  ;;  %400 = vmatprep.mubr.msk.f32.mxu0 %vm581_vm0, %v580_v0  ;;  %v55_v2 = vld [vmem:[%s685_s1] sm:$0xff]  ;;  %v138_v4 = vld [vmem:[#allocation2] sm:$0xff]  ;;  %v139_v5 = vld [vmem:[#allocation2 + $0x8] sm:$0xff]  ;;  %v325_v62 = vlaneseq }
  0x27   :  { %473 = vmatprep.subr.bf16.mxu1 %v582_v1  ;;  %435 = vmatprep.mubr.msk.f32.mxu1 %vm581_vm0, %v580_v0  ;;  %v54_v3 = vld [vmem:[%s684_s0] sm:$0xff]  ;;  %v141_v7 = vld [vmem:[#allocation2 + $0x18] sm:$0xff]  ;;  %v474_v8 = vpack.c.bf16 %v139_v5, %v138_v4  ;;  %v142_v10 = vld [vmem:[#allocation2 + $0x20] sm:$0xff] }
  0x28   :  { %399 = vmatpush3.msra.mxu0 %v55_v2  ;;  %v140_v6 = vld [vmem:[#allocation2 + $0x10] sm:$0xff]  ;;  %v143_v11 = vld [vmem:[#allocation2 + $0x28] sm:$0xff]  ;;  %v145_v14 = vld [vmem:[#allocation2 + $0x38] sm:$0xff]  ;;  %v326_v63 = vand.u32 127, %v325_v62 }
  0x29   :  { %401 = vmatmul.mubr.msk.f32.vlgmr.msra.gmra.mrb[0].mxu0 %vm63_vm1, %v54_v3  ;;  %497 = vmatprep.subr.bf16.mxu0 %v582_v1  ;;  %v477_v9 = vpack.c.bf16 %v141_v7, %v140_v6  ;;  %v480_v12 = vpack.c.bf16 %v143_v11, %v142_v10  ;;  %v144_v13 = vld [vmem:[#allocation2 + $0x30] sm:$0xff]  ;;  %v146_v16 = vld [vmem:[#allocation2 + $0x40] sm:$0xff]  ;;  %v147_v17 = vld [vmem:[#allocation2 + $0x48] sm:$0xff] }
  0x2a   :  { %470 = vmatprep.mubr.msk.f32.mxu0 %vm581_vm0, %v580_v0  ;;  %475 = vmatpush3.bf16.msra.mxu1 %v474_v8  ;;  %v483_v15 = vpack.c.bf16 %v145_v14, %v144_v13  ;;  %v486_v18 = vpack.c.bf16 %v147_v17, %v146_v16  ;;  %v148_v19 = vld [vmem:[#allocation2 + $0x50] sm:$0xff]  ;;  %v149_v20 = vld [vmem:[#allocation2 + $0x58] sm:$0xff]  ;;  %v150_v22 = vld [vmem:[#allocation2 + $0x60] sm:$0xff]  ;;  %vm327_vm2 = vcmp.lt.s32.totalorder %v326_v63, 4  ;;  %vm348_vm6 = vcmp.eq.s32.totalorder %v326_v63, 4 }
  0x2b   :  { %476 = vmatprep.subr.bf16.mxu1 %v582_v1  ;;  %v489_v21 = vpack.c.bf16 %v149_v20, %v148_v19  ;;  %v151_v23 = vld [vmem:[#allocation2 + $0x68] sm:$0xff]  ;;  %v152_v25 = vld [vmem:[#allocation2 + $0x70] sm:$0xff]  ;;  %v153_v26 = vld [vmem:[#allocation2 + $0x78] sm:$0xff] }
  0x2c   :  { %v492_v24 = vpack.c.bf16 %v151_v23, %v150_v22  ;;  %v495_v27 = vpack.c.bf16 %v153_v26, %v152_v25  ;;  %v232_v28 = vld [vmem:[#allocation4] sm:$0xff]  ;;  %v233_v29 = vld [vmem:[#allocation4 + $0x8] sm:$0xff]  ;;  %v234_v30 = vld [vmem:[#allocation4 + $0x10] sm:$0xff] }
  0x2d   :  { %v498_v31 = vpack.c.bf16 %v233_v29, %v232_v28  ;;  %v235_v32 = vld [vmem:[#allocation4 + $0x18] sm:$0xff]  ;;  %v236_v34 = vld [vmem:[#allocation4 + $0x20] sm:$0xff]  ;;  %v237_v35 = vld [vmem:[#allocation4 + $0x28] sm:$0xff] }
  0x2e   :  { %478 = vmatpush3.bf16.msra.mxu1 %v477_v9  ;;  %v501_v33 = vpack.c.bf16 %v235_v32, %v234_v30  ;;  %v504_v36 = vpack.c.bf16 %v237_v35, %v236_v34  ;;  %v238_v37 = vld [vmem:[#allocation4 + $0x30] sm:$0xff]  ;;  %v239_v38 = vld [vmem:[#allocation4 + $0x38] sm:$0xff]  ;;  %v240_v40 = vld [vmem:[#allocation4 + $0x40] sm:$0xff] }
  0x2f   :  { %479 = vmatprep.subr.bf16.mxu1 %v582_v1  ;;  %499 = vmatpush3.bf16.msra.mxu0 %v498_v31  ;;  %v507_v39 = vpack.c.bf16 %v239_v38, %v238_v37  ;;  %v241_v41 = vld [vmem:[#allocation4 + $0x48] sm:$0xff]  ;;  %v242_v43 = vld [vmem:[#allocation4 + $0x50] sm:$0xff]  ;;  %v243_v44 = vld [vmem:[#allocation4 + $0x58] sm:$0xff] }
  0x30   :  { %500 = vmatprep.subr.bf16.mxu0 %v582_v1  ;;  %v510_v42 = vpack.c.bf16 %v241_v41, %v240_v40  ;;  %v513_v45 = vpack.c.bf16 %v243_v44, %v242_v43  ;;  %v244_v46 = vld [vmem:[#allocation4 + $0x60] sm:$0xff]  ;;  %v245_v47 = vld [vmem:[#allocation4 + $0x68] sm:$0xff]  ;;  %v358_v49 = vld [vmem:[%s686_s2] ss:$0 sm:$0xff] }
  0x31   :  { %v516_v48 = vpack.c.bf16 %v245_v47, %v244_v46  ;;  %v246_v54 = vld [vmem:[#allocation4 + $0x70] sm:$0xff]  ;;  %v247_v55 = vld [vmem:[#allocation4 + $0x78] sm:$0xff] }
  0x32   :  { %481 = vmatpush3.bf16.msra.mxu1 %v480_v12  ;;  %v519_v56 = vpack.c.bf16 %v247_v55, %v246_v54  ;;  %v360_v57 = vld [vmem:[%s688_s4] ss:$0 sm:$0xff] }
  0x33   :  { %482 = vmatprep.subr.bf16.mxu1 %v582_v1  ;;  %502 = vmatpush3.bf16.msra.mxu0 %v501_v33  ;;  %v361_v0 = vld [vmem:[%s690_s6] ss:$0 sm:$0xff] }
  0x34   :  { %503 = vmatprep.subr.bf16.mxu0 %v582_v1 }
  0x36   :  { %484 = vmatpush3.bf16.msra.mxu1 %v483_v15 }
  0x37   :  { %485 = vmatprep.subr.bf16.mxu1 %v582_v1  ;;  %505 = vmatpush3.bf16.msra.mxu0 %v504_v36 }
  0x38   :  { %506 = vmatprep.subr.bf16.mxu0 %v582_v1 }
  0x3a   :  { %487 = vmatpush3.bf16.msra.mxu1 %v486_v18 }
  0x3b   :  { %488 = vmatprep.subr.bf16.mxu1 %v582_v1  ;;  %508 = vmatpush3.bf16.msra.mxu0 %v507_v39 }
  0x3c   :  { %509 = vmatprep.subr.bf16.mxu0 %v582_v1 }
  0x3e   :  { %490 = vmatpush3.bf16.msra.mxu1 %v489_v21 }
  0x3f   :  { %491 = vmatprep.subr.bf16.mxu1 %v582_v1  ;;  %511 = vmatpush3.bf16.msra.mxu0 %v510_v42 }
  0x40   :  { %512 = vmatprep.subr.bf16.mxu0 %v582_v1 }
  0x42   :  { %493 = vmatpush3.bf16.msra.mxu1 %v492_v24 }
  0x43   :  { %494 = vmatprep.subr.bf16.mxu1 %v582_v1  ;;  %514 = vmatpush3.bf16.msra.mxu0 %v513_v45 }
  0x44   :  { %515 = vmatprep.subr.bf16.mxu0 %v582_v1 }
  0x46   :  { %496 = vmatpush3.bf16.msra.mxu1 %v495_v27 }
  0x47   :  { %517 = vmatpush3.bf16.msra.mxu0 %v516_v48 }
  0x48   :  { %518 = vmatprep.subr.bf16.mxu0 %v582_v1 }
  0x4b   :  { %520 = vmatpush3.bf16.msra.mxu0 %v519_v56 }
  0xfc   :  { %v133_v50 = vpop.f32.mrb[0].mxu0 }
  0xfd   :  { %v134_v51 = vadd.f32 %v358_v49, %v133_v50  ;;  %v402_v52 = vpop.f32.mrb[1].mxu0 }
  0xff   :  { %v137_v53 = vmax.f32 %v134_v51, 0.0 }
 0x101   :  { %436 = vmatmul.mubr.f32.vlgmr.msra.gmra.mrb[0].mxu1 %v137_v53 }
 0x1d4   :  { %v227_v58 = vpop.f32.mrb[0].mxu1 }
 0x1d5   :  { %v228_v59 = vadd.f32 %v360_v57, %v227_v58  ;;  %v437_v60 = vpop.f32.mrb[1].mxu1 }
 0x1d7   :  { %v231_v61 = vmax.f32 %v228_v59, 0.0 }
 0x1d9   :  { %471 = vmatmul.mubr.f32.vlgmr.msra.gmra.mrb[2].mxu0 %v231_v61 }
 0x2ac   :  { %v321_v1 = vpop.f32.mrb[2].mxu0 }
 0x2ad   :  { %v322_v2 = vadd.f32 %v361_v0, %v321_v1  ;;  %v472_v3 = vpop.f32.mrb[3].mxu0 }
 0x2af   :  { %v328_v4 = vsel %vm327_vm2, %v322_v2, -inf }
 0x2b0   :  { %329 = vmax.xlane.f32.xlu0 %v328_v4 }
 0x33d   :  { %v330_v5 = vpop.xlane.xlu0 %329 }
 0x33e   :  { %vm331_vm3 = vcmp.eq.f32.partialorder %v328_v4, %v330_v5 }
 0x33f   :  { %vm332_vm4 = vmand %vm331_vm3, %vm327_vm2 }
 0x340   :  { %v333_v6 = vsel %vm332_vm4, %v326_v63, 2147483647 }
 0x341   :  { %v335_v7 = vshra.s32 %v333_v6, 16  ;;  %v334_v9 = vand.u32 65535, %v333_v6 }
 0x343   :  { %v337_v8 = vcvt.s32.f32 %v335_v7  ;;  %v336_v11 = vcvt.s32.f32 %v334_v9 }
 0x345   :  { %338 = vmin.xlane.f32.xlu0 %v337_v8 }
 0x3d2   :  { %v339_v10 = vpop.xlane.xlu0 %338 }
 0x3d3   :  { %vm340_vm5 = vcmp.eq.f32.partialorder %v337_v8, %v339_v10  ;;  %v345_v13 = vcvt.f32.s32 %v339_v10 }
 0x3d4   :  { %v341_v12 = vsel %vm340_vm5, %v336_v11, inf }
 0x3d5   :  { %342 = vmin.xlane.f32.xlu1 %v341_v12  ;;  %v346_v15 = vshll.u32 %v345_v13, 16 }
 0x462   :  { %v343_v14 = vpop.xlane.xlu1 %342 }
 0x463   :  { %v344_v16 = vcvt.f32.s32 %v343_v14 }
 0x465   :  { %v347_v17 = vadd.s32 %v346_v15, %v344_v16 }
 0x467   :  { %v349_v18 = vcvt.s32.f32 %v347_v17 }
 0x469   :  { %v350_v19 = vsel %vm348_vm6, %v349_v18, %v322_v2 }
 0x46a   :  { %351 = vst [vmem:[%s691_s7] sm:$0xff] %v350_v19 }
 0x46b   :  { %356 = vsyncpa [#allocation3], 1 }
 0x46c   :  { %357 = vsyncpa [#allocation5], 1 }

</bundles_post_ra>
